<compile_context>
chip_gen: v5e
topology: v5e:2x2
jax: 0.10.0
libtpu: 0.0.40
codegen_flags: <defaults>
</compile_context>

<pallas_src>
import jax
import jax.numpy as jnp
from jax.experimental import pallas as pl
from jax.experimental.pallas import tpu as pltpu


LANE = 128            # hidden dim padded to a multiple of the 128-lane vreg width
SUBLANE = 16          # bf16 sublane packing -> batch tile kept a multiple of 16
MAX_BATCH_TILE = 512  # large tiles amortize per-step overhead & fill the MXU M axis
_VMEM_SCOPED_DEFAULT = 32 * 1024 * 1024
_VMEM_SAFE_CAP = 64 * 1024 * 1024     # v7x physical VMEM ceiling (safe everywhere)

# Older releases used pltpu.TPUCompilerParams; prefer the current name.
_CompilerParams = getattr(pltpu, "CompilerParams", None) or getattr(
    pltpu, "TPUCompilerParams")


def _round_up(x, m):
    return ((x + m - 1) // m) * m


# ----------------------------------------------------------------------------
# Probe: does this JAX support single-buffered (pipeline_mode=pl.Buffered(1))
# constant-index blocks on the TPU pallas_call pipeline?  Probed once with a
# tiny kernel so the real forward never fails because of it.
# ----------------------------------------------------------------------------
_SINGLE_BUFFER_OK = None


def _single_buffer_supported():
    global _SINGLE_BUFFER_OK
    if _SINGLE_BUFFER_OK is not None:
        return _SINGLE_BUFFER_OK
    ok = False
    if hasattr(pl, "Buffered"):
        try:
            def _probe_kernel(w_ref, x_ref, o_ref):
                o_ref[...] = x_ref[...] + w_ref[...]

            probe = pl.pallas_call(
                _probe_kernel,
                out_shape=jax.ShapeDtypeStruct((16, 128), jnp.float32),
                grid_spec=pl.GridSpec(
                    grid=(2,),
                    in_specs=[
                        pl.BlockSpec((8, 128), lambda i: (0, 0),
                                     pipeline_mode=pl.Buffered(1)),
                        pl.BlockSpec((8, 128), lambda i: (i, 0)),
                    ],
                    out_specs=pl.BlockSpec((8, 128), lambda i: (i, 0)),
                ),
            )
            jax.jit(probe).lower(
                jax.ShapeDtypeStruct((8, 128), jnp.float32),
                jax.ShapeDtypeStruct((16, 128), jnp.float32),
            ).compile()
            ok = True
        except Exception:
            ok = False
    _SINGLE_BUFFER_OK = ok
    return ok


def _resident_spec(shape, single_buffer):
    """BlockSpec for a VMEM-resident (constant block index) weight/bias."""
    index_map = lambda i, _n=len(shape): (0,) * _n
    if single_buffer:
        return pl.BlockSpec(shape, index_map, pipeline_mode=pl.Buffered(1))
    return pl.BlockSpec(shape, index_map)


# ----------------------------------------------------------------------------
# One-time parameter preparation (review item 1): pad hidden dim to 128 lanes,
# cast MXU operands to bf16, keep biases in f32.  Cached at module init.
# ----------------------------------------------------------------------------
def prepare_mlp_params(w1, b1, w2, b2):
    d_in, d_hid = w1.shape
    d_out = w2.shape[1]
    d_hid_p = _round_up(d_hid, LANE)

    w1p = jnp.zeros((d_in, d_hid_p), jnp.bfloat16).at[:, :d_hid].set(
        w1.astype(jnp.bfloat16))
    b1p = jnp.zeros((1, d_hid_p), jnp.float32).at[:, :d_hid].set(
        b1.astype(jnp.float32).reshape(1, -1))
    w2p = jnp.zeros((d_hid_p, d_out), jnp.bfloat16).at[:d_hid, :].set(
        w2.astype(jnp.bfloat16))
    b2p = b2.astype(jnp.float32).reshape(1, -1)
    return w1p, b1p, w2p, b2p


# ----------------------------------------------------------------------------
# Fused MLP kernel: out = relu(x @ W1 + b1) @ W2 + b2
#   bf16 MXU operands, f32 accumulation, f32 epilogue (bias + ReLU).
# ----------------------------------------------------------------------------
def _mlp_kernel(x_ref, w1_ref, b1_ref, w2_ref, b2_ref, o_ref):
    x = x_ref[...].astype(w1_ref.dtype)                     # load x, cast to bf16
    h = jnp.dot(x, w1_ref[...], preferred_element_type=jnp.float32)
    h = jnp.maximum(h + b1_ref[...], 0.0)                   # f32 bias + ReLU
    # TODO(synk): on v5e at very large batch tiles, split this epilogue + second
    # matmul over row halves (lax.fori_loop(unroll=True)) if vreg spills appear.
    o = jnp.dot(h.astype(w2_ref.dtype), w2_ref[...],
                preferred_element_type=jnp.float32)
    o_ref[...] = (o + b2_ref[...]).astype(o_ref.dtype)


def mlp_forward(x, w1p, b1p, w2p, b2p):
    """Fused 2-layer MLP via one pallas_call over batch tiles.

    Weights are pre-padded/pre-cast (see prepare_mlp_params); x and the output
    keep their logical feature widths so no padded HBM traffic is generated.
    """
    B, d_in = x.shape
    d_hid_p, d_out = w2p.shape
    assert w1p.shape == (d_in, d_hid_p)

    # ---- batch tiling: big tiles; >= 2 grid steps when B allows (v7x megacore)
    tb = min(MAX_BATCH_TILE, _round_up(B, SUBLANE))
    if _round_up(B, tb) // tb < 2 and tb >= 2 * SUBLANE:
        tb = _round_up(tb // 2, SUBLANE)
    b_p = _round_up(B, tb)
    n_tiles = b_p // tb

    # Batch padding only (feature dims stay logical).
    xp = x if b_p == B else jnp.zeros((b_p, d_in), x.dtype).at[:B, :].set(x)

    out_dtype = x.dtype   # bf16 activations -> bf16 (half) writeback automatically

    single_buffer = _single_buffer_supported()

    # ---- VMEM budget derived from the actual footprint (review) ----
    x_item = jnp.dtype(x.dtype).itemsize
    o_item = jnp.dtype(out_dtype).itemsize
    params_bytes = (w1p.size + w2p.size) * 2 + (b1p.size + b2p.size) * 4
    weight_bufs = 1 if single_buffer else 2
    vmem_needed = (2 * (tb * d_in * x_item + tb * d_out * o_item)   # dbl-buffered act
                   + weight_bufs * params_bytes                     # resident weights
                   + tb * d_hid_p * 4                               # f32 hidden tile
                   + (1 << 20))                                     # margin
    compiler_kwargs = dict(dimension_semantics=("parallel",))
    if vmem_needed > _VMEM_SCOPED_DEFAULT:
        compiler_kwargs["vmem_limit_bytes"] = int(min(vmem_needed, _VMEM_SAFE_CAP))
    # TODO(synk): when resident weights approach the 64 MiB v7x VMEM ceiling,
    # switch to a K-tiled grid ("arbitrary" reduction axis + f32 accumulator scratch).

    flops = 2 * b_p * (d_in * d_hid_p + d_hid_p * d_out)
    bytes_accessed = (xp.size * x_item + params_bytes + b_p * d_out * o_item)

    out = pl.pallas_call(
        _mlp_kernel,
        out_shape=jax.ShapeDtypeStruct((b_p, d_out), out_dtype),
        grid_spec=pl.GridSpec(
            grid=(n_tiles,),
            in_specs=[
                # activations: pipelined (double-buffered) over batch tiles
                pl.BlockSpec((tb, d_in), lambda i: (i, 0)),
                # weights / biases: constant block index -> VMEM-resident
                _resident_spec((d_in, d_hid_p), single_buffer),
                _resident_spec((1, d_hid_p), single_buffer),
                _resident_spec((d_hid_p, d_out), single_buffer),
                _resident_spec((1, d_out), single_buffer),
            ],
            out_specs=pl.BlockSpec((tb, d_out), lambda i: (i, 0)),
        ),
        compiler_params=_CompilerParams(**compiler_kwargs),
        cost_estimate=pl.CostEstimate(
            flops=flops, transcendentals=0, bytes_accessed=bytes_accessed),
    )(xp, w1p, b1p, w2p, b2p)

    return out if b_p == B else out[:B, :]


# ----------------------------------------------------------------------------
# Wrapped "nn.Module": deterministic 2-layer MLP parameters
# ----------------------------------------------------------------------------
class MLPModule:
    """Stand-in for the nn.Module that SPMD wraps (Linear -> ReLU -> Linear)."""

    def __init__(self, d_in=32, d_hidden=64, d_out=32, dtype=jnp.float32, seed=0):
        k1, k2, k3, k4 = jax.random.split(jax.random.PRNGKey(seed), 4)
        s1 = 1.0 / jnp.sqrt(d_in)
        s2 = 1.0 / jnp.sqrt(d_hidden)
        self.w1 = jax.random.normal(k1, (d_in, d_hidden), dtype) * s1
        self.b1 = jax.random.normal(k2, (1, d_hidden), dtype) * s1
        self.w2 = jax.random.normal(k3, (d_hidden, d_out), dtype) * s2
        self.b2 = jax.random.normal(k4, (1, d_out), dtype) * s2
        # Pad / bf16-cast the static params ONCE (hoisted out of the per-call
        # path).  On a single device dist.broadcast(p, 0) is the identity, so
        # these cached copies stay consistent with the raw params.
        _single_buffer_supported()   # warm the Buffered(1) probe outside jit
        self._packed = prepare_mlp_params(self.w1, self.b1, self.w2, self.b2)

    def parameters(self):
        return [self.w1, self.b1, self.w2, self.b2]

    def __call__(self, x):
        return mlp_forward(x, *self._packed)


# ----------------------------------------------------------------------------
# SPMD wrapper semantics (Replicate()-only, single device)
# ----------------------------------------------------------------------------
class SPMD:
    """JAX analogue of spmd.compiler.api.SPMD.

    With Replicate() placements, parameters are broadcast from rank 0 (an
    identity on one device) and the distributed graph module computes the same
    function as the original module; forward dispatches to the compiled
    (Pallas-backed) module lazily on first call.
    """

    def __init__(self, module, schema_placements=("Replicate()",)):
        assert list(schema_placements) == ["Replicate()"], \
            "SPMD only support Replicate() parameters for now"
        # dist.broadcast(p, src=0) -> identity on a single device.
        # TODO(synk): multi-device parameter broadcast (make_async_remote_copy
        #             collective) not needed for single-device semantics.
        self._orig_module = module
        self._compiled_m = None

    def forward(self, *args, **kwargs):
        if self._compiled_m is None:
            # "distribute(...)": with Replicate() params the distributed graph
            # is numerically the original module; compile it with jit.
            self._compiled_m = jax.jit(self._orig_module.__call__)
        return self._compiled_m(*args, **kwargs)

    __call__ = forward


# ----------------------------------------------------------------------------
# Main
# ----------------------------------------------------------------------------
if __name__ == "__main__":
    B, D_IN, D_HID, D_OUT = 8, 32, 64, 32

    module = MLPModule(d_in=D_IN, d_hidden=D_HID, d_out=D_OUT, seed=0)
    spmd = SPMD(module)

    key = jax.random.PRNGKey(0)
    x = jax.random.normal(key, (B, D_IN), jnp.float32)

    out = spmd(x)
    out = jax.block_until_ready(out)
    assert out.shape == (B, D_OUT)
    assert out.dtype == x.dtype

    # Reference matching the kernel's numerics (bf16 MXU operands, f32 accumulate).
    h_ref = jnp.dot(x.astype(jnp.bfloat16), module.w1.astype(jnp.bfloat16),
                    preferred_element_type=jnp.float32) + module.b1
    h_ref = jnp.maximum(h_ref, 0.0)
    ref_bf16 = jnp.dot(h_ref.astype(jnp.bfloat16), module.w2.astype(jnp.bfloat16),
                       preferred_element_type=jnp.float32) + module.b2
    assert jnp.allclose(out, ref_bf16.astype(out.dtype), atol=2e-3, rtol=2e-3)

    # Sanity check against the full-f32 reference of the wrapped module.
    ref_f32 = jnp.maximum(x @ module.w1 + module.b1, 0.0) @ module.w2 + module.b2
    assert jnp.allclose(out, ref_f32, atol=5e-2, rtol=5e-2)

    print("KERNEL_OK")
</pallas_src>

<mosaic_0001>
module attributes {stable_mosaic.version = 11 : i64} {
  func.func @_mlp_kernel(%arg0: i32, %arg1: memref<16x32xf32, #tpu.memory_space<vmem>>, %arg2: memref<32x128xbf16, #tpu.memory_space<vmem>>, %arg3: memref<1x128xf32, #tpu.memory_space<vmem>>, %arg4: memref<128x32xbf16, #tpu.memory_space<vmem>>, %arg5: memref<1x32xf32, #tpu.memory_space<vmem>>, %arg6: memref<16x32xf32, #tpu.memory_space<vmem>>) attributes {dimension_semantics = [#tpu.dimension_semantics<parallel>], iteration_bounds = array<i64: 1>, scalar_prefetch = 0 : i64, scratch_operands = 0 : i64, tpu.core_type = #tpu.core_type<tc>, window_params = [{transform_indices = @transform_0, window_bounds = array<i64: 16, 32>}, {pipeline_mode = #tpu.pipeline_mode<synchronous>, transform_indices = @transform_1, window_bounds = array<i64: 32, 128>}, {pipeline_mode = #tpu.pipeline_mode<synchronous>, transform_indices = @transform_2, window_bounds = array<i64: 1, 128>}, {pipeline_mode = #tpu.pipeline_mode<synchronous>, transform_indices = @transform_3, window_bounds = array<i64: 128, 32>}, {pipeline_mode = #tpu.pipeline_mode<synchronous>, transform_indices = @transform_4, window_bounds = array<i64: 1, 32>}, {transform_indices = @transform_5, window_bounds = array<i64: 16, 32>}]} {
    %c0 = arith.constant 0 : index
    %c0_0 = arith.constant 0 : index
    %0 = vector.load %arg1[%c0, %c0_0] : memref<16x32xf32, #tpu.memory_space<vmem>>, vector<16x32xf32>
    %1 = arith.truncf %0 : vector<16x32xf32> to vector<16x32xbf16>
    %c0_1 = arith.constant 0 : index
    %c0_2 = arith.constant 0 : index
    %2 = vector.load %arg2[%c0_1, %c0_2] : memref<32x128xbf16, #tpu.memory_space<vmem>>, vector<32x128xbf16>
    %cst = arith.constant dense<0.000000e+00> : vector<16x128xf32>
    %3 = tpu.matmul %1, %2, %cst {dimension_numbers = #tpu.dot_dimension_numbers<[1], [0], [0], [1], [0, 0, 1, 1], [], []>} : vector<16x32xbf16>, vector<32x128xbf16>, vector<16x128xf32> -> vector<16x128xf32>
    %c0_3 = arith.constant 0 : index
    %c0_4 = arith.constant 0 : index
    %4 = vector.load %arg3[%c0_3, %c0_4] : memref<1x128xf32, #tpu.memory_space<vmem>>, vector<1x128xf32>
    %5 = vector.broadcast %4 : vector<1x128xf32> to vector<16x128xf32>
    %6 = arith.addf %3, %5 : vector<16x128xf32>
    %cst_5 = arith.constant 0.000000e+00 : f32
    %7 = vector.broadcast %cst_5 : f32 to vector<16x128xf32>
    %8 = arith.maximumf %6, %7 : vector<16x128xf32>
    %9 = arith.truncf %8 : vector<16x128xf32> to vector<16x128xbf16>
    %c0_6 = arith.constant 0 : index
    %c0_7 = arith.constant 0 : index
    %10 = vector.load %arg4[%c0_6, %c0_7] : memref<128x32xbf16, #tpu.memory_space<vmem>>, vector<128x32xbf16>
    %cst_8 = arith.constant dense<0.000000e+00> : vector<16x32xf32>
    %11 = tpu.matmul %9, %10, %cst_8 {dimension_numbers = #tpu.dot_dimension_numbers<[1], [0], [0], [1], [0, 0, 1, 1], [], []>} : vector<16x128xbf16>, vector<128x32xbf16>, vector<16x32xf32> -> vector<16x32xf32>
    %c0_9 = arith.constant 0 : index
    %c0_10 = arith.constant 0 : index
    %12 = vector.load %arg5[%c0_9, %c0_10] : memref<1x32xf32, #tpu.memory_space<vmem>>, vector<1x32xf32>
    %13 = vector.broadcast %12 : vector<1x32xf32> to vector<16x32xf32>
    %14 = arith.addf %11, %13 : vector<16x32xf32>
    %c0_11 = arith.constant 0 : index
    %c0_12 = arith.constant 0 : index
    %15 = vector.load %arg6[%c0_11, %c0_12] : memref<16x32xf32, #tpu.memory_space<vmem>>, vector<16x32xf32>
    tpu.vector_store %arg6[%c0_11, %c0_12], %14 {strides = array<i32>} : memref<16x32xf32, #tpu.memory_space<vmem>>, vector<16x32xf32>,
    return
  }
  func.func @transform_0(%arg0: i32) -> (i32, i32) {
    %c0_i32 = arith.constant 0 : i32
    %c0_i32_0 = arith.constant 0 : i32
    return %arg0, %c0_i32 : i32, i32
  }
  func.func @transform_1(%arg0: i32) -> (i32, i32) {
    %c0_i32 = arith.constant 0 : i32
    %c0_i32_0 = arith.constant 0 : i32
    %c0_i32_1 = arith.constant 0 : i32
    return %c0_i32, %c0_i32_0 : i32, i32
  }
  func.func @transform_2(%arg0: i32) -> (i32, i32) {
    %c0_i32 = arith.constant 0 : i32
    %c0_i32_0 = arith.constant 0 : i32
    %c0_i32_1 = arith.constant 0 : i32
    return %c0_i32, %c0_i32_0 : i32, i32
  }
  func.func @transform_3(%arg0: i32) -> (i32, i32) {
    %c0_i32 = arith.constant 0 : i32
    %c0_i32_0 = arith.constant 0 : i32
    %c0_i32_1 = arith.constant 0 : i32
    return %c0_i32, %c0_i32_0 : i32, i32
  }
  func.func @transform_4(%arg0: i32) -> (i32, i32) {
    %c0_i32 = arith.constant 0 : i32
    %c0_i32_0 = arith.constant 0 : i32
    %c0_i32_1 = arith.constant 0 : i32
    return %c0_i32, %c0_i32_0 : i32, i32
  }
  func.func @transform_5(%arg0: i32) -> (i32, i32) {
    %c0_i32 = arith.constant 0 : i32
    %c0_i32_0 = arith.constant 0 : i32
    return %arg0, %c0_i32 : i32, i32
  }
}

</mosaic_0001>

<bundles_post_ra>
// kernel: a_call__.1
= control target key start
LH: loop header
LB: loop body
LE: loop exit
PB: predicated region body
PF: predicated region fallthrough
CT: control target
= control target key end

     0   :  { %10 = vsyncpa [#allocation3], 0  ;;  %s252_s21 = smov [#allocation2]   ;;  %s253_s23 = smov 64   ;;  %s315_s0 = inlined_call_operand.vmem [shape: f32[16,32], index: 0, kind: input, shape index: {}]   ;;  %s316_s1 = inlined_call_operand.vmem [shape: bf16[32,128], index: 1, kind: input, shape index: {}]   ;;  %s317_s2 = inlined_call_operand.vmem [shape: f32[1,128], index: 2, kind: input, shape index: {}]   ;;  %s318_s3 = inlined_call_operand.hbm [shape: bf16[128,32], index: 3, kind: input, shape index: {}]   ;;  %s319_s4 = inlined_call_operand.vmem [shape: f32[1,32], index: 4, kind: input, shape index: {}]   ;;  %s320_s5 = inlined_call_operand.vmem [shape: f32[16,32], index: 5, kind: output, shape index: {}]  }
   0x1   :  { %s21_s20 = sshll.u32 %s318_s3, 4  ;;  %s23_s22 = sshll.u32 %s252_s21, 4  ;;  %s22_s20 = int_to_ptr.hbm [resolvable:$true] %s21_s20  ;;  %s24_s22 = int_to_ptr.vmem [resolvable:$true] %s23_s22 }
   0x2   :  { %s254_s24 = smov 4  }
   0x3   :  { %29 = dma.hbm_to_vmem [thread:$0]  %s22_s20, 1024, %s24_s22, [#allocation3], %s253_s23, %s253_s23, %s254_s24  }
   0x4   :  { %250 = dma.done.wait [#allocation3], 1024  }
   0x5   :  { %251 = vsyncadd [#allocation3], 4294966272  ;;  %v212_v0 = vld [vmem:[%s316_s1 + $0x8] sm:$0xff]  ;;  %v211_v1 = vld [vmem:[%s316_s1] sm:$0xff]  ;;  %vm60_vm0 = vcmask 261120  }
   0x6   :  { %v220_v2 = vld [vmem:[#allocation2 + $0x38] sm:$0xff]  ;;  %70 = vmatpush.bf16.msra.mxu0 %v212_v0  ;;  %v37_v3 = vld [vmem:[%s315_s0] sm:$0xff]  ;;  %v38_v4 = vld [vmem:[%s315_s0 + $0x8] sm:$0xff] }
   0x7   :  { %149 = vmatpush.bf16.msra.mxu1 %v220_v2  ;;  %v219_v5 = vld [vmem:[#allocation2 + $0x30] sm:$0xff]  ;;  %v39_v6 = vpack.c.bf16 %v38_v4, %v37_v3  ;;  %v218_v7 = vld [vmem:[#allocation2 + $0x28] sm:$0xff]  ;;  %v217_v8 = vld [vmem:[#allocation2 + $0x20] sm:$0xff] }
   0x8   :  { %v216_v9 = vld [vmem:[#allocation2 + $0x18] sm:$0xff]  ;;  %v215_v10 = vld [vmem:[#allocation2 + $0x10] sm:$0xff]  ;;  %v214_v11 = vld [vmem:[#allocation2 + $0x8] sm:$0xff] }
   0x9   :  { %v213_v12 = vld [vmem:[#allocation2] sm:$0xff] }
   0xa   :  { %71 = vmatpush.bf16.msra.mxu0 %v211_v1  ;;  %v224_v14 = vld [vmem:[%s317_s2] ss:$0 sm:$0xff] }
   0xb   :  { %150 = vmatpush.bf16.msra.mxu1 %v219_v5  ;;  %v225_v21 = vld [vmem:[%s319_s4] ss:$0 sm:$0xff] }
   0xd   :  { %178 = vmatmul.msk.bf16.vlgmr.msra.gmra.mxu0 %vm60_vm0, %v39_v6 }
   0xf   :  { %151 = vmatpush.bf16.msra.mxu1 %v218_v7 }
  0x13   :  { %152 = vmatpush.bf16.msra.mxu1 %v217_v8 }
  0x17   :  { %153 = vmatpush.bf16.msra.mxu1 %v216_v9 }
  0x1b   :  { %154 = vmatpush.bf16.msra.mxu1 %v215_v10 }
  0x1f   :  { %155 = vmatpush.bf16.msra.mxu1 %v214_v11 }
  0x23   :  { %156 = vmatpush.bf16.msra.mxu1 %v213_v12 }
  0x8a   :  { %v73_v13 = vpop.f32.mrf.mxu0 }
  0x8b   :  { %v74_v15 = vadd.f32 %v224_v14, %v73_v13 }
  0x8d   :  { %v78_v18 = vmax.f32 %v74_v15, 0.0 }
  0x92   :  { %v75_v16 = vpop.f32.mrf.mxu0 }
  0x93   :  { %v76_v17 = vadd.f32 %v224_v14, %v75_v16 }
  0x95   :  { %v79_v19 = vmax.f32 %v76_v17, 0.0 }
  0x97   :  { %v80_v20 = vpack.c.bf16 %v79_v19, %v78_v18 }
  0x99   :  { %157 = vmatmul.bf16.vlgmr.msra.gmra.mxu1 %v80_v20 }
 0x116   :  { %v158_v22 = vpop.f32.mrf.mxu1 }
 0x117   :  { %v159_v23 = vadd.f32 %v225_v21, %v158_v22 }
 0x119   :  { %163 = vst.msk [vmem:[%s320_s5] sm:$0xff] %vm60_vm0, %v159_v23 }
 0x11e   :  { %v160_v24 = vpop.f32.mrf.mxu1 }
 0x11f   :  { %v161_v25 = vadd.f32 %v225_v21, %v160_v24 }
 0x121   :  { %164 = vst.msk [vmem:[%s320_s5 + $0x8] sm:$0xff] %vm60_vm0, %v161_v25 }
 0x122   :  { %169 = vsyncpa [#allocation3], 1 }

</bundles_post_ra>
